<compile_context>
chip_gen: v6e
topology: v6e:2x2x1
jax: 0.10.0
libtpu: 0.0.40
codegen_flags: <defaults>
</compile_context>

<pallas_src>
import functools

import jax
import jax.numpy as jnp
from jax.experimental import pallas as pl
from jax.experimental.pallas import tpu as pltpu


def _round_up(x: int, m: int) -> int:
    return ((x + m - 1) // m) * m


def _vmem_budget() -> tuple[int, int]:
    """(per-buffer byte budget, scoped-VMEM limit) for the local TPU generation."""
    try:
        cap = int(pltpu.get_tpu_info().vmem_capacity_bytes)
    except Exception:  # query unavailable -> assume the smaller (v7x) VMEM
        cap = 64 * 1024 * 1024
    if cap <= 64 * 1024 * 1024:                      # v7x-class: 64 MiB / core
        return 8 * 1024 * 1024, 32 * 1024 * 1024
    return 16 * 1024 * 1024, 48 * 1024 * 1024        # v5e / v6e: 128 MiB


def _pick_tiles(n: int, c: int, itemsize: int, budget_bytes: int) -> tuple[int, int]:
    """Return (tile_rows, sub_rows): DMA tile sized by bytes, chunk by vregs."""
    # Compute sub-chunk: ~64 KiB of f32 logits, power of two in [8, 256] rows.
    sub = min(256, max(8, 65536 // max(1, c * 4)))
    sub = 1 << (sub.bit_length() - 1)
    # DMA tile: as many rows as fit the per-buffer budget. Conservatively count
    # 512 B/row for the (rows, 1) int32 target block (lane-padded in VMEM).
    per_row = c * itemsize + 512
    rows = max(sub, (budget_bytes // per_row) // sub * sub)
    n_up = _round_up(n, 16)
    if n_up <= rows:                                  # whole batch in one tile
        if n_up <= sub:
            return n_up, n_up
        return _round_up(n_up, sub), sub
    return rows, sub


def _focal_ce_partial_kernel(logits_ref, target_ref, out_ref, *,
                             n_total: int, tile_rows: int, sub_rows: int,
                             blocks_per_core: int):
    """Accumulates a per-core partial sum of per-sample cross entropies."""
    p = pl.program_id(0)                  # "core" (parallel) axis
    i = pl.program_id(1)                  # streaming (arbitrary) axis

    @pl.when(i == 0)
    def _init():
        out_ref[0, 0] = jnp.float32(0.0)

    c = logits_ref.shape[1]
    num_chunks = tile_rows // sub_rows
    row0_tile = (p * blocks_per_core + i) * tile_rows
    # (1, C) class-id iota, hoisted out of the chunk loop; the `== tgt`
    # compare broadcasts it across sublanes.
    cls_ids = jax.lax.broadcasted_iota(jnp.int32, (1, c), 1)

    def chunk(j, partial):
        r0 = j * sub_rows
        if not isinstance(r0, int):
            r0 = pl.multiple_of(r0, sub_rows)
        logits = logits_ref[pl.ds(r0, sub_rows), :].astype(jnp.float32)   # (S, C)
        tgt = target_ref[pl.ds(r0, sub_rows), :]                          # (S, 1)
        # Per-row cross entropy: logsumexp(logits) - logits[target].
        m = jnp.max(logits, axis=-1, keepdims=True)
        lse = m + jnp.log(jnp.sum(jnp.exp(logits - m), axis=-1, keepdims=True))
        tgt_logit = jnp.sum(jnp.where(cls_ids == tgt, logits, 0.0),
                            axis=-1, keepdims=True)
        ce = lse - tgt_logit                                              # (S, 1)
        # Ragged tail / clamped duplicate blocks: SELECT (not multiply) so
        # undefined rows (possibly NaN/Inf) contribute exactly 0.
        row_ids = row0_tile + r0 + jax.lax.broadcasted_iota(
            jnp.int32, (sub_rows, 1), 0)
        ce = jnp.where(row_ids < n_total, ce, 0.0)
        return partial + jnp.sum(ce)

    tile_sum = jax.lax.fori_loop(0, num_chunks, chunk, jnp.float32(0.0),
                                 unroll=num_chunks <= 4)
    out_ref[0, 0] += tile_sum             # once per (multi-MiB) tile


def focal_loss(logits: jax.Array, target: jax.Array, gamma: float = 2.0,
               tile_rows: int | None = None,
               sub_rows: int | None = None) -> jax.Array:
    """logits: (N, C) float (f32/bf16), target: (N,) int -> scalar float32."""
    n, c = logits.shape
    itemsize = jnp.dtype(logits.dtype).itemsize
    budget, vmem_cap = _vmem_budget()
    tn, sub = _pick_tiles(n, c, itemsize, budget)
    if tile_rows is not None:             # test / tuning overrides
        tn = max(16, _round_up(int(tile_rows), 16))
        sub = tn
    if sub_rows is not None:
        sub = max(8, (int(sub_rows) // 8) * 8)
        tn = _round_up(tn, sub)

    num_blocks = pl.cdiv(n, tn)
    # Two-way split so v7x's two TensorCores each stream half the row blocks;
    # on single-core chips the extra axis just iterates (<=1 wasted tile).
    num_par = 2 if num_blocks > 1 else 1
    bpc = pl.cdiv(num_blocks, num_par)

    target2d = target.astype(jnp.int32).reshape(n, 1)

    def row_block_map(p, i):
        # Clamp so blocks past the end (uneven core split) re-read the last
        # real block; those rows are masked out inside the kernel.
        return (jnp.minimum(p * bpc + i, num_blocks - 1), 0)

    tile_bytes = tn * (c * itemsize + 512)
    vmem_limit = int(min(vmem_cap,
                         max(16 * 1024 * 1024, 2 * tile_bytes + 4 * 1024 * 1024)))

    partials = pl.pallas_call(
        functools.partial(_focal_ce_partial_kernel, n_total=n, tile_rows=tn,
                          sub_rows=sub, blocks_per_core=bpc),
        out_shape=jax.ShapeDtypeStruct((num_par, 1), jnp.float32),
        grid_spec=pltpu.PrefetchScalarGridSpec(
            num_scalar_prefetch=0,
            grid=(num_par, bpc),
            in_specs=[
                pl.BlockSpec((tn, c), row_block_map),
                pl.BlockSpec((tn, 1), row_block_map),
            ],
            out_specs=pl.BlockSpec((1, 1), lambda p, i: (p, 0),
                                   memory_space=pltpu.SMEM),
        ),
        compiler_params=pltpu.CompilerParams(
            dimension_semantics=("parallel", "arbitrary"),
            vmem_limit_bytes=vmem_limit,
        ),
        cost_estimate=pl.CostEstimate(
            flops=6 * n * c,
            transcendentals=n * c,
            bytes_accessed=n * c * itemsize + n * 4 + num_par * 4,
        ),
    )(logits, target2d)

    # Tiny scalar epilogue: mean CE over the true N, then the focal transform.
    logp = jnp.sum(partials) / jnp.float32(n)
    prob = jnp.exp(-logp)
    return ((1.0 - prob) ** gamma * logp).astype(jnp.float32)


def _focal_loss_ref(logits, target, gamma=2.0):
    """Pure-JAX reference mirroring the PyTorch module."""
    logits = logits.astype(jnp.float32)
    log_probs = jax.nn.log_softmax(logits, axis=-1)
    nll = -jnp.take_along_axis(log_probs, target[:, None].astype(jnp.int32), axis=-1)
    logp = jnp.mean(nll)
    p = jnp.exp(-logp)
    return (1.0 - p) ** gamma * logp


if __name__ == "__main__":
    key = jax.random.PRNGKey(0)
    k1, k2, k3, k4, k5, k6 = jax.random.split(key, 6)

    # Test 1: small f32 problem, single tile (block larger than N, masked).
    N, C = 8, 32
    logits = jax.random.normal(k1, (N, C), dtype=jnp.float32)
    target = jax.random.randint(k2, (N,), 0, C, dtype=jnp.int32)
    loss = focal_loss(logits, target, gamma=2.0)
    jax.block_until_ready(loss)
    ref = _focal_loss_ref(logits, target, gamma=2.0)
    assert jnp.allclose(loss, ref, atol=1e-5, rtol=1e-5), (loss, ref)

    # Test 2: bf16 logits, 4 row blocks over the 2-way "parallel" axis,
    # ragged (masked) last block, no wrapper-side padding of logits.
    N2, C2 = 50, 48
    logits2 = jax.random.normal(k3, (N2, C2), dtype=jnp.bfloat16)
    target2 = jax.random.randint(k4, (N2,), 0, C2, dtype=jnp.int32)
    loss2 = focal_loss(logits2, target2, gamma=2.0, tile_rows=16)
    jax.block_until_ready(loss2)
    ref2 = _focal_loss_ref(logits2, target2, gamma=2.0)
    assert jnp.allclose(loss2, ref2, atol=1e-4, rtol=1e-4), (loss2, ref2)

    # Test 3: multi-chunk tiles (fori_loop path) plus a fully-masked clamped
    # block from the uneven 2-way split.
    N3, C3 = 70, 8
    logits3 = jax.random.normal(k5, (N3, C3), dtype=jnp.float32)
    target3 = jax.random.randint(k6, (N3,), 0, C3, dtype=jnp.int32)
    loss3 = focal_loss(logits3, target3, gamma=2.0, tile_rows=32, sub_rows=16)
    jax.block_until_ready(loss3)
    ref3 = _focal_loss_ref(logits3, target3, gamma=2.0)
    assert jnp.allclose(loss3, ref3, atol=1e-5, rtol=1e-5), (loss3, ref3)

    print("KERNEL_OK")
</pallas_src>

<mosaic_0001>
module attributes {stable_mosaic.version = 11 : i64} {
  func.func @_focal_ce_partial_kernel(%arg0: i32, %arg1: i32, %arg2: memref<16x32xf32, #tpu.memory_space<vmem>>, %arg3: memref<16x1xi32, #tpu.memory_space<vmem>>, %arg4: memref<1x1xf32, #tpu.memory_space<smem>>) attributes {dimension_semantics = [#tpu.dimension_semantics<parallel>, #tpu.dimension_semantics<arbitrary>], iteration_bounds = array<i64: 1, 1>, scalar_prefetch = 0 : i64, scratch_operands = 0 : i64, tpu.core_type = #tpu.core_type<tc>, window_params = [{transform_indices = @transform_0, window_bounds = array<i64: 16, 32>}, {transform_indices = @transform_1, window_bounds = array<i64: 16, 1>}, {transform_indices = @transform_2, window_bounds = array<i64: 1, 1>}]} {
    %c0_i32 = arith.constant 0 : i32
    %0 = arith.cmpi eq, %arg1, %c0_i32 : i32
    %1 = arith.extui %0 : i1 to i32
    %c0_i32_0 = arith.constant 0 : i32
    %2 = arith.cmpi ne, %1, %c0_i32_0 : i32
    scf.if %2 {
      %cst_15 = arith.constant 0.000000e+00 : f32
      %c0_16 = arith.constant 0 : index
      %c0_17 = arith.constant 0 : index
      %46 = memref.load %arg4[%c0_16, %c0_17] : memref<1x1xf32, #tpu.memory_space<smem>>
      memref.store %cst_15, %arg4[%c0_16, %c0_17] : memref<1x1xf32, #tpu.memory_space<smem>>
    } else {
    }
    %c1_i32 = arith.constant 1 : i32
    %3 = arith.muli %arg0, %c1_i32 : i32
    %4 = arith.addi %3, %arg1 : i32
    %c16_i32 = arith.constant 16 : i32
    %5 = arith.muli %4, %c16_i32 : i32
    %6 = tpu.iota {dimensions = array<i32: 1>} : vector<1x32xi32>
    %cst = arith.constant 0.000000e+00 : f32
    %c0_i32_1 = arith.constant 0 : i32
    %c16_i32_2 = arith.constant 16 : i32
    %7 = arith.muli %c0_i32_1, %c16_i32_2 : i32
    %8 = tpu.assume_multiple %7, 16 : i32
    %9 = arith.index_cast %8 : i32 to index
    %c0 = arith.constant 0 : index
    %10 = vector.load %arg2[%9, %c0] : memref<16x32xf32, #tpu.memory_space<vmem>>, vector<16x32xf32>
    %11 = arith.index_cast %8 : i32 to index
    %c0_3 = arith.constant 0 : index
    %12 = vector.load %arg3[%11, %c0_3] : memref<16x1xi32, #tpu.memory_space<vmem>>, vector<16x1xi32>
    %cst_4 = arith.constant dense<0xFF800000> : vector<16xf32>
    %13 = vector.multi_reduction <maximumf>, %10, %cst_4 [1] : vector<16x32xf32> to vector<16xf32>
    %14 = vector.shape_cast %13 : vector<16xf32> to vector<16x1xf32>
    %15 = vector.broadcast %14 : vector<16x1xf32> to vector<16x32xf32>
    %16 = arith.subf %10, %15 : vector<16x32xf32>
    %17 = math.exp %16 : vector<16x32xf32>
    %cst_5 = arith.constant dense<0.000000e+00> : vector<16xf32>
    %18 = vector.multi_reduction <add>, %17, %cst_5 [1] : vector<16x32xf32> to vector<16xf32>
    %19 = vector.shape_cast %18 : vector<16xf32> to vector<16x1xf32>
    %20 = math.log %19 : vector<16x1xf32>
    %21 = arith.addf %14, %20 : vector<16x1xf32>
    %22 = vector.broadcast %6 : vector<1x32xi32> to vector<16x32xi32>
    %23 = vector.broadcast %12 : vector<16x1xi32> to vector<16x32xi32>
    %24 = arith.cmpi eq, %22, %23 : vector<16x32xi32>
    %cst_6 = arith.constant 0.000000e+00 : f32
    %25 = vector.broadcast %cst_6 : f32 to vector<16x32xf32>
    %26 = arith.select %24, %10, %25 : vector<16x32xi1>, vector<16x32xf32>
    %cst_7 = arith.constant dense<0.000000e+00> : vector<16xf32>
    %27 = vector.multi_reduction <add>, %26, %cst_7 [1] : vector<16x32xf32> to vector<16xf32>
    %28 = vector.shape_cast %27 : vector<16xf32> to vector<16x1xf32>
    %29 = arith.subf %21, %28 : vector<16x1xf32>
    %30 = arith.addi %5, %8 : i32
    %31 = tpu.iota {dimensions = array<i32: 0>} : vector<16x1xi32>
    %32 = vector.broadcast %30 : i32 to vector<16x1xi32>
    %33 = arith.addi %32, %31 : vector<16x1xi32>
    %c8_i32 = arith.constant 8 : i32
    %34 = vector.broadcast %c8_i32 : i32 to vector<16x1xi32>
    %35 = arith.cmpi slt, %33, %34 : vector<16x1xi32>
    %cst_8 = arith.constant 0.000000e+00 : f32
    %36 = vector.broadcast %cst_8 : f32 to vector<16x1xf32>
    %37 = arith.select %35, %29, %36 : vector<16x1xi1>, vector<16x1xf32>
    %38 = vector.shape_cast %37 : vector<16x1xf32> to vector<1x16x1xf32>
    %cst_9 = arith.constant dense<0.000000e+00> : vector<1xf32>
    %39 = vector.multi_reduction <add>, %38, %cst_9 [1, 2] : vector<1x16x1xf32> to vector<1xf32>
    %40 = vector.shape_cast %39 : vector<1xf32> to vector<1x1x1xf32>
    %41 = vector.extract %40[0, 0, 0] : f32 from vector<1x1x1xf32>
    %42 = arith.addf %cst, %41 : f32
    %c1_i32_10 = arith.constant 1 : i32
    %c0_11 = arith.constant 0 : index
    %c0_12 = arith.constant 0 : index
    %43 = memref.load %arg4[%c0_11, %c0_12] : memref<1x1xf32, #tpu.memory_space<smem>>
    %44 = arith.addf %43, %42 : f32
    %c0_13 = arith.constant 0 : index
    %c0_14 = arith.constant 0 : index
    %45 = memref.load %arg4[%c0_13, %c0_14] : memref<1x1xf32, #tpu.memory_space<smem>>
    memref.store %44, %arg4[%c0_13, %c0_14] : memref<1x1xf32, #tpu.memory_space<smem>>
    return
  }
  func.func @transform_0(%arg0: i32, %arg1: i32) -> (i32, i32) {
    %c1_i32 = arith.constant 1 : i32
    %0 = arith.muli %arg0, %c1_i32 : i32
    %1 = arith.addi %0, %arg1 : i32
    %c0_i32 = arith.constant 0 : i32
    %2 = arith.minsi %1, %c0_i32 : i32
    %c0_i32_0 = arith.constant 0 : i32
    %c0_i32_1 = arith.constant 0 : i32
    return %2, %c0_i32_0 : i32, i32
  }
  func.func @transform_1(%arg0: i32, %arg1: i32) -> (i32, i32) {
    %c1_i32 = arith.constant 1 : i32
    %0 = arith.muli %arg0, %c1_i32 : i32
    %1 = arith.addi %0, %arg1 : i32
    %c0_i32 = arith.constant 0 : i32
    %2 = arith.minsi %1, %c0_i32 : i32
    %c0_i32_0 = arith.constant 0 : i32
    %c0_i32_1 = arith.constant 0 : i32
    return %2, %c0_i32_0 : i32, i32
  }
  func.func @transform_2(%arg0: i32, %arg1: i32) -> (i32, i32) {
    %c0_i32 = arith.constant 0 : i32
    %c0_i32_0 = arith.constant 0 : i32
    return %arg0, %c0_i32 : i32, i32
  }
}

</mosaic_0001>

<bundles_post_ra>
// kernel: tpu_custom_call.1
= control target key start
LH: loop header
LB: loop body
LE: loop exit
PB: predicated region body
PF: predicated region fallthrough
CT: control target
= control target key end

     0   :  { %vm110_vm0 = vcmask 261120   ;;  %s256_s0 = inlined_call_operand.vmem [shape: f32[8,32], index: 0, kind: input, shape index: {}]   ;;  %s257_s1 = inlined_call_operand.vmem [shape: s32[8,1], index: 1, kind: input, shape index: {}]   ;;  %s258_s2 = inlined_call_operand.hbm [shape: f32[1,1], index: 2, kind: output, shape index: {}]  }
   0x1   :  { %v106_v0 = vld [vmem:[%s256_s0] sm:$0xff] }
   0x2   :  { %7 = vsyncpa [#allocation3], 0  ;;  %v111_v1 = vsel %vm110_vm0, %v106_v0, -inf  ;;  %v227_v2 = vmov 0   ;;  %v108_v3 = vld [vmem:[%s257_s1] sm:$0xff]  ;;  %v104_v7 = vlaneseq  ;;  %vm164_vm2 = vcmask 7168  }
   0x3   :  { %212 = vset.pattern.permute.xlu0 %v227_v2  ;;  %s228_s1 = smov [#allocation2]  }
   0x4   :  { %112 = vmax.xlane.f32.xlu0 %v111_v1  ;;  %v105_v8 = vand.u32 127, %v104_v7 }
  0x1a   :  { %136 = vperm.xlu0 %212, %v108_v3  }
  0x8d   :  { %v113_v4 = vpop.xlane.xlu0 %112 }
  0x8e   :  { %v117_v5 = vsub.f32 %v106_v0, %v113_v4 }
  0x90   :  { %v119_v6 = vmul.f32 1.442695, %v117_v5 }
  0x92   :  { %213 = vpow2.f32 %v119_v6 }
  0x95   :  { %v137_v9 = vpop.permute.xlu0 %136 }
  0x96   :  { %vm141_vm1 = vcmp.eq.s32.totalorder %v105_v8, %v137_v9 }
  0x97   :  { %v143_v11 = vsel %vm141_vm1, %v106_v0, 0.0 }
  0x98   :  { %v145_v13 = vsel %vm110_vm0, %v143_v11, 0.0 }
  0x9f   :  { %v214_v10 = vpop.eup %213 }
  0xa0   :  { %v123_v12 = vsel %vm110_vm0, %v214_v10, 0.0 }
  0xa1   :  { %124 = vadd.xlane.f32.xlu1 %v123_v12 }
  0xa5   :  { %146 = vadd.xlane.f32.xlu1 %v145_v13 }
 0x12a   :  { %v125_v14 = vpop.xlane.xlu1 %124 }
 0x12b   :  { %215 = vlog2.f32 %v125_v14 }
 0x12e   :  { %v147_v17 = vpop.xlane.xlu1 %146 }
 0x138   :  { %v216_v15 = vpop.eup %215 }
 0x139   :  { %v130_v16 = vmul.f32 0.6931472, %v216_v15 }
 0x13b   :  { %v133_v18 = vadd.f32 %v130_v16, %v113_v4 }
 0x13d   :  { %v151_v19 = vsub.f32 %v133_v18, %v147_v17 }
 0x13f   :  { %v165_v20 = vsel %vm164_vm2, %v151_v19, 0.0 }
 0x140   :  { %168 = vadd.xlane.f32.xlu1 %v165_v20 }
 0x1c9   :  { %v169_v21 = vpop.xlane.xlu1 %168 }
 0x1ca   :  { %v170_v22 = vrot.slane %v169_v21, 4 }
 0x1cc   :  { %v171_v23 = vadd.f32 %v170_v22, %v169_v21 }
 0x1ce   :  { %v172_v24 = vrot.slane %v171_v23, 2 }
 0x1d0   :  { %v173_v25 = vadd.f32 %v172_v24, %v171_v23 }
 0x1d2   :  { %v174_v26 = vrot.slane %v173_v25, 1 }
 0x1d4   :  { %v175_v27 = vadd.f32 %v174_v26, %v173_v25 }
 0x1d6   :  { %207 = vpush %v175_v27 }
 0x207   :  { %s208_s0 = spop %207 }
 0x208   :  { %181 = sst [smem:[#allocation2]] %s208_s0 }
 0x209   :  { %189 = dma.smem_to_hbm %s228_s1, 16, %s258_s2, [#allocation3]  }
 0x20a   :  { %225 = dma.done.wait [#allocation3], 16  }
 0x20b   :  { %226 = vsyncadd [#allocation3], 4294967280 }
 0x20c   :  { %193 = sfence }
 0x20d   :  { %194 = vsyncpa [#allocation3], 1 }

</bundles_post_ra>
